<compile_context>
chip_gen: v7x
topology: tpu7x:2x2x1
jax: 0.10.0
libtpu: 0.0.40
codegen_flags: <defaults>
</compile_context>

<pallas_src>
import numpy as np
import jax
import jax.numpy as jnp
from jax.experimental import pallas as pl
from jax.experimental.pallas import tpu as pltpu


# ----------------------------------------------------------------------------
# Deterministic parameter construction (mirrors OrthHalfLinear.__init__,
# torch replaced by numpy).
# ----------------------------------------------------------------------------
def build_base(num_features: int, num_classes: int, seed: int = 0):
    rng = np.random.RandomState(seed)
    rnd_indices = rng.permutation(np.arange(num_features))
    n = num_features // num_classes
    feat_indices = [rnd_indices[i * n:(i + 1) * n].copy() for i in range(num_classes)]
    rem = num_features % num_classes
    rem_indices = rng.permutation(np.arange(num_classes))[:rem]
    for i, rem_idx in enumerate(rem_indices):
        feat_indices[rem_idx] = np.append(feat_indices[rem_idx],
                                          rnd_indices[num_classes * n + i])
    mask = np.zeros((num_classes, num_features), dtype=np.int64)
    base = np.zeros((num_classes, num_features), dtype=np.float32)
    for i in range(num_classes):
        base[i][feat_indices[i]] = 1.0
        v = rng.rand(len(feat_indices[i]))
        v = np.where(v < 0.5, 1, -1).astype(np.int64)
        mask[i][feat_indices[i]] = v
    # F.normalize(base, dim=1): L2-normalize each row (eps=1e-12 like torch).
    norm = np.maximum(np.linalg.norm(base, axis=1, keepdims=True), 1e-12)
    base = mask.astype(np.float32) * (base / norm)
    return base.astype(np.float32), feat_indices


def _round_up(x: int, m: int) -> int:
    return ((x + m - 1) // m) * m


def _cdiv(a: int, b: int) -> int:
    return (a + b - 1) // b


# ----------------------------------------------------------------------------
# Kernel: (bm, tk) x-tile @ (tk, tn) pre-transposed sign-tile, accumulated
# directly in the f32 output block (resident across the K grid axis), with the
# per-class scale applied on the last K step.
# ----------------------------------------------------------------------------
def orth_linear_kernel(x_ref, w_ref, s_ref, o_ref):
    k = pl.program_id(2)

    @pl.when(k == 0)
    def _():
        o_ref[...] = jnp.zeros_like(o_ref)

    o_ref[...] += jnp.dot(x_ref[...], w_ref[...],
                          preferred_element_type=jnp.float32)

    @pl.when(k == pl.num_programs(2) - 1)
    def _():
        o_ref[...] = o_ref[...] * s_ref[...]   # (1, tn) broadcast per-class scale


def orth_half_linear(x: jax.Array, base: jax.Array, *,
                     compute_dtype=jnp.bfloat16,
                     bm_max: int | None = None,
                     tn_max: int | None = None,
                     tk_max: int | None = None) -> jax.Array:
    """x: (B, num_features), base: (num_classes, num_features) -> (B, num_classes)."""
    B, Fdim = x.shape
    C, Fw = base.shape
    assert Fw == Fdim

    # -- decompose base = signs (exact {0, ±1}) * per-class scale ------------
    base_f32 = base.astype(jnp.float32)
    scale = jnp.max(jnp.abs(base_f32), axis=1, keepdims=True)       # (C, 1) = 1/||row||
    safe = jnp.where(scale > 0, scale, jnp.float32(1.0))
    signs = base_f32 / safe                                         # exactly ±1 / 0
    w = signs.T.astype(compute_dtype)                               # (F, C), pre-transposed
    scale_row = scale.T                                             # (1, C), f32

    in_bytes = jnp.dtype(compute_dtype).itemsize
    sub = {4: 8, 2: 16, 1: 32}[in_bytes]                            # sublane packing

    # -- chip-aware tile caps / VMEM budget -----------------------------------
    try:
        vmem_cap = int(pltpu.get_tpu_info().vmem_capacity_bytes)
    except Exception:
        vmem_cap = 64 << 20
    big_vmem = vmem_cap >= (100 << 20)                              # v5e/v6e vs v7x
    if bm_max is None:
        bm_max = 1024 if big_vmem else 512
    if tn_max is None:
        tn_max = 512
    if tk_max is None:
        tk_max = 2048 if big_vmem else 1024

    # -- adaptive tiling: cap padding waste, keep lane/sublane alignment ------
    B8 = _round_up(B, sub)
    nb = _cdiv(B8, bm_max)
    bm = _round_up(_cdiv(B8, nb), sub)
    Bp = bm * nb

    Cp = _round_up(C, 128)
    nn_t = _cdiv(Cp, tn_max)
    tn = _round_up(_cdiv(Cp, nn_t), 128)
    Cp = tn * nn_t

    Fp = _round_up(Fdim, 128)
    nk = _cdiv(Fp, tk_max)
    tk = _round_up(_cdiv(Fp, nk), 128)
    Fp = tk * nk

    # Give both v7x TensorCores work when the parallel grid would be 1x1.
    if nb == 1 and nn_t == 1 and Cp >= 256:
        nn_t = 2
        tn = _round_up(_cdiv(Cp, 2), 128)
        Cp = tn * nn_t

    # -- zero-padding is exact: padded features contribute 0, padded rows/cols
    #    are sliced off below.
    x_p = x.astype(compute_dtype)
    if (Bp, Fp) != (B, Fdim):
        x_p = jnp.pad(x_p, ((0, Bp - B), (0, Fp - Fdim)))
    if (Fp, Cp) != (Fdim, C):
        w = jnp.pad(w, ((0, Fp - Fdim), (0, Cp - C)))
    if Cp != C:
        scale_row = jnp.pad(scale_row, ((0, 0), (0, Cp - C)))

    grid = (nb, nn_t, nk)

    # Working set (double-buffered inputs + output) → explicit VMEM budget.
    work_set = (2 * bm * tk * in_bytes + 2 * tk * tn * in_bytes
                + 2 * bm * tn * 4 + 2 * tn * 4)
    vmem_limit = int(min(vmem_cap * 3 // 4, max(2 * work_set, 32 << 20)))

    # x is re-read nn_t times, the weight nb times under this schedule.
    cost = pl.CostEstimate(
        flops=2 * Bp * Fp * Cp,
        transcendentals=0,
        bytes_accessed=int(in_bytes * (Bp * Fp * nn_t + Fp * Cp * nb) + 4 * Bp * Cp),
    )

    out = pl.pallas_call(
        orth_linear_kernel,
        out_shape=jax.ShapeDtypeStruct((Bp, Cp), jnp.float32),
        grid_spec=pltpu.PrefetchScalarGridSpec(
            num_scalar_prefetch=0,
            grid=grid,
            in_specs=[
                pl.BlockSpec((bm, tk), lambda i, j, k: (i, k)),   # x tile
                pl.BlockSpec((tk, tn), lambda i, j, k: (k, j)),   # signs.T tile (F, C)
                pl.BlockSpec((1, tn), lambda i, j, k: (0, j)),    # per-class scale
            ],
            out_specs=pl.BlockSpec((bm, tn), lambda i, j, k: (i, j)),
        ),
        compiler_params=pltpu.CompilerParams(
            dimension_semantics=("parallel", "parallel", "arbitrary"),
            vmem_limit_bytes=vmem_limit,
        ),
        cost_estimate=cost,
    )(x_p, w, scale_row)

    return out[:B, :C].astype(x.dtype)


if __name__ == "__main__":
    # --- test 1: small shape, exact f32 compute path -------------------------
    batch, num_features, num_classes = 8, 32, 8
    base_np, _ = build_base(num_features, num_classes, seed=0)
    base = jnp.asarray(base_np)
    key = jax.random.PRNGKey(0)
    x = jax.random.normal(key, (batch, num_features), dtype=jnp.float32)

    out = jax.block_until_ready(orth_half_linear(x, base, compute_dtype=jnp.float32))
    ref = x @ base.T                                  # F.linear(x, base)
    assert out.shape == (batch, num_classes)
    np.testing.assert_allclose(np.asarray(out), np.asarray(ref), rtol=1e-5, atol=1e-5)

    # --- test 2: small shape, bf16 compute path (signs exact, x cast only) ---
    out_bf = jax.block_until_ready(orth_half_linear(x, base))
    np.testing.assert_allclose(np.asarray(out_bf), np.asarray(ref), rtol=2e-2, atol=3e-2)

    # --- test 3: ragged multi-tile path (several grid steps on every axis) ---
    B2, F2, C2 = 300, 1024, 200
    base2_np, _ = build_base(F2, C2, seed=1)
    base2 = jnp.asarray(base2_np)
    x2 = jax.random.normal(jax.random.PRNGKey(1), (B2, F2), dtype=jnp.float32)

    out2 = jax.block_until_ready(
        orth_half_linear(x2, base2, bm_max=128, tn_max=128, tk_max=256))
    ref2 = x2 @ base2.T
    assert out2.shape == (B2, C2)
    np.testing.assert_allclose(np.asarray(out2), np.asarray(ref2), rtol=2e-2, atol=3e-2)

    print("KERNEL_OK")
</pallas_src>

<mosaic_0001>
module attributes {stable_mosaic.version = 11 : i64} {
  func.func @orth_linear_kernel(%arg0: i32, %arg1: i32, %arg2: i32, %arg3: memref<8x128xf32, #tpu.memory_space<vmem>>, %arg4: memref<128x128xf32, #tpu.memory_space<vmem>>, %arg5: memref<1x128xf32, #tpu.memory_space<vmem>>, %arg6: memref<8x128xf32, #tpu.memory_space<vmem>>) attributes {dimension_semantics = [#tpu.dimension_semantics<parallel>, #tpu.dimension_semantics<parallel>, #tpu.dimension_semantics<arbitrary>], iteration_bounds = array<i64: 1, 1, 1>, scalar_prefetch = 0 : i64, scratch_operands = 0 : i64, tpu.core_type = #tpu.core_type<tc>, window_params = [{transform_indices = @transform_0, window_bounds = array<i64: 8, 128>}, {transform_indices = @transform_1, window_bounds = array<i64: 128, 128>}, {transform_indices = @transform_2, window_bounds = array<i64: 1, 128>}, {transform_indices = @transform_3, window_bounds = array<i64: 8, 128>}]} {
    %c0_i32 = arith.constant 0 : i32
    %0 = arith.cmpi eq, %arg2, %c0_i32 : i32
    %1 = arith.extui %0 : i1 to i32
    %c0_i32_0 = arith.constant 0 : i32
    %2 = arith.cmpi ne, %1, %c0_i32_0 : i32
    scf.if %2 {
      %cst_10 = arith.constant 0.000000e+00 : f32
      %12 = vector.broadcast %cst_10 : f32 to vector<8x128xf32>
      %c0_11 = arith.constant 0 : index
      %c0_12 = arith.constant 0 : index
      %13 = vector.load %arg6[%c0_11, %c0_12] : memref<8x128xf32, #tpu.memory_space<vmem>>, vector<8x128xf32>
      tpu.vector_store %arg6[%c0_11, %c0_12], %12 {strides = array<i32>} : memref<8x128xf32, #tpu.memory_space<vmem>>, vector<8x128xf32>,
    } else {
    }
    %c0 = arith.constant 0 : index
    %c0_1 = arith.constant 0 : index
    %3 = vector.load %arg6[%c0, %c0_1] : memref<8x128xf32, #tpu.memory_space<vmem>>, vector<8x128xf32>
    %c0_2 = arith.constant 0 : index
    %c0_3 = arith.constant 0 : index
    %4 = vector.load %arg3[%c0_2, %c0_3] : memref<8x128xf32, #tpu.memory_space<vmem>>, vector<8x128xf32>
    %c0_4 = arith.constant 0 : index
    %c0_5 = arith.constant 0 : index
    %5 = vector.load %arg4[%c0_4, %c0_5] : memref<128x128xf32, #tpu.memory_space<vmem>>, vector<128x128xf32>
    %cst = arith.constant dense<0.000000e+00> : vector<8x128xf32>
    %6 = tpu.matmul %4, %5, %cst {dimension_numbers = #tpu.dot_dimension_numbers<[1], [0], [0], [1], [0, 0, 1, 1], [], []>} : vector<8x128xf32>, vector<128x128xf32>, vector<8x128xf32> -> vector<8x128xf32>
    %7 = arith.addf %3, %6 : vector<8x128xf32>
    %c0_6 = arith.constant 0 : index
    %c0_7 = arith.constant 0 : index
    %8 = vector.load %arg6[%c0_6, %c0_7] : memref<8x128xf32, #tpu.memory_space<vmem>>, vector<8x128xf32>
    tpu.vector_store %arg6[%c0_6, %c0_7], %7 {strides = array<i32>} : memref<8x128xf32, #tpu.memory_space<vmem>>, vector<8x128xf32>,
    %c0_i32_8 = arith.constant 0 : i32
    %9 = arith.cmpi eq, %arg2, %c0_i32_8 : i32
    %10 = arith.extui %9 : i1 to i32
    %c0_i32_9 = arith.constant 0 : i32
    %11 = arith.cmpi ne, %10, %c0_i32_9 : i32
    scf.if %11 {
      %c0_10 = arith.constant 0 : index
      %c0_11 = arith.constant 0 : index
      %12 = vector.load %arg6[%c0_10, %c0_11] : memref<8x128xf32, #tpu.memory_space<vmem>>, vector<8x128xf32>
      %c0_12 = arith.constant 0 : index
      %c0_13 = arith.constant 0 : index
      %13 = vector.load %arg5[%c0_12, %c0_13] : memref<1x128xf32, #tpu.memory_space<vmem>>, vector<1x128xf32>
      %14 = vector.broadcast %13 : vector<1x128xf32> to vector<8x128xf32>
      %15 = arith.mulf %12, %14 : vector<8x128xf32>
      %c0_14 = arith.constant 0 : index
      %c0_15 = arith.constant 0 : index
      %16 = vector.load %arg6[%c0_14, %c0_15] : memref<8x128xf32, #tpu.memory_space<vmem>>, vector<8x128xf32>
      tpu.vector_store %arg6[%c0_14, %c0_15], %15 {strides = array<i32>} : memref<8x128xf32, #tpu.memory_space<vmem>>, vector<8x128xf32>,
    } else {
    }
    return
  }
  func.func @transform_0(%arg0: i32, %arg1: i32, %arg2: i32) -> (i32, i32) {
    %c0_i32 = arith.constant 0 : i32
    return %arg0, %arg2 : i32, i32
  }
  func.func @transform_1(%arg0: i32, %arg1: i32, %arg2: i32) -> (i32, i32) {
    %c0_i32 = arith.constant 0 : i32
    return %arg2, %arg1 : i32, i32
  }
  func.func @transform_2(%arg0: i32, %arg1: i32, %arg2: i32) -> (i32, i32) {
    %c0_i32 = arith.constant 0 : i32
    %c0_i32_0 = arith.constant 0 : i32
    return %c0_i32, %arg1 : i32, i32
  }
  func.func @transform_3(%arg0: i32, %arg1: i32, %arg2: i32) -> (i32, i32) {
    %c0_i32 = arith.constant 0 : i32
    return %arg0, %arg1 : i32, i32
  }
}

</mosaic_0001>

<bundles_post_ra>
// kernel: tpu_custom_call.1
= control target key start
LH: loop header
LB: loop body
LE: loop exit
PB: predicated region body
PF: predicated region fallthrough
CT: control target
= control target key end

     0   :  { %8 = vsyncpa [#allocation3], 0  ;;  %s396_s0 = inlined_call_operand.hbm [shape: f32[8,128], index: 0, kind: input, shape index: {}]   ;;  %s397_s1 = inlined_call_operand.hbm [shape: f32[128,128], index: 1, kind: input, shape index: {}]   ;;  %s398_s2 = inlined_call_operand.vmem [shape: f32[1,128], index: 2, kind: input, shape index: {}]   ;;  %s399_s3 = inlined_call_operand.hbm [shape: f32[8,128], index: 3, kind: output, shape index: {}]  }
   0x1   :  { %9 = vsyncpa [#allocation6], 0 }
   0x2   :  { %10 = vsyncpa [#allocation4], 0  ;;  %s322_s12 = smov [#allocation2]   ;;  %s323_s14 = smov [#allocation5]  }
   0x3   :  { %s17_s13 = sshll.u32 %s322_s12, 4  ;;  %s26_s15 = sshll.u32 %s323_s14, 4  ;;  %s18_s13 = int_to_ptr.vmem [resolvable:$true] %s17_s13  ;;  %s350_s15 = int_to_ptr.vmem [resolvable:$true] %s26_s15 }
   0x4   :  { %s250_s18 = scalar_lea.hbm %s396_s0, 128 }
   0x5   :  { %p251_p0 = scmp.ne.s32.totalorder %s396_s0, %s250_s18  ;;  %p254_p1 = scmp.lt.u32.totalorder %s250_s18, %s396_s0 }
   0x7   :  { %p256_p2 = pnand %p254_p1, %p251_p0 }
   0x9   :  { %259 = shalt.err (!%p256_p2)
}
   0xa   :  { %s260_s23 = scalar_lea.vmem %s18_s13, 128  ;;  %p265_p4 = scmp.lt.s32.totalorder %s18_s13, %s18_s13 }
   0xb   :  { %p261_p3 = scmp.ne.s32.totalorder %s18_s13, %s260_s23  ;;  %p266_p5 = scmp.lt.s32.totalorder %s260_s23, %s260_s23 }
   0xd   :  { %p267_p6 = por %p266_p5, %p265_p4 }
   0xf   :  { %p268_p7 = pnand %p267_p6, %p261_p3 }
  0x11   :  { %271 = shalt.err (!%p268_p7)
}
  0x12   :  { %20 = dma.hbm_to_vmem [thread:$0]  %s396_s0, 128, %s18_s13, [#allocation3]  }
  0x13   :  { %s272_s28 = scalar_lea.hbm %s397_s1, 2048 }
  0x14   :  { %p273_p8 = scmp.ne.s32.totalorder %s397_s1, %s272_s28  ;;  %p276_p9 = scmp.lt.u32.totalorder %s272_s28, %s397_s1 }
  0x16   :  { %p278_p10 = pnand %p276_p9, %p273_p8 }
  0x18   :  { %281 = shalt.err (!%p278_p10)
}
  0x19   :  { %s282_s6 = scalar_lea.vmem %s350_s15, 2048  ;;  %p287_p12 = scmp.lt.s32.totalorder %s350_s15, %s350_s15 }
  0x1a   :  { %p283_p11 = scmp.ne.s32.totalorder %s350_s15, %s282_s6  ;;  %p288_p13 = scmp.lt.s32.totalorder %s282_s6, %s282_s6 }
  0x1c   :  { %p289_p0 = por %p288_p13, %p287_p12 }
  0x1e   :  { %p290_p1 = pnand %p289_p0, %p283_p11 }
  0x20   :  { %293 = shalt.err (!%p290_p1)
}
  0x21   :  { %s324_s0 = smov 128   ;;  %s325_s7 = smov 8  }
  0x22   :  { %32 = dma.hbm_to_vmem [thread:$0]  %s397_s1, 2048, %s350_s15, [#allocation6], %s324_s0, %s324_s0, %s325_s7  }
  0x23   :  { %316 = dma.done.wait [#allocation3], 128  }
  0x24   :  { %317 = vsyncadd [#allocation3], 4294967168 }
  0x25   :  { %318 = dma.done.wait [#allocation6], 2048  }
  0x26   :  { %319 = vsyncadd [#allocation6], 4294965248  ;;  %v326_v0 = vmov 0.0|0.0   ;;  %vm327_vm0 = vmmov 0   ;;  %v328_v1 = vmov 0.0   ;;  %v48_v2 = vld [vmem:[#allocation5] sm:$0xff] }
  0x27   :  { %218 = vmatprep.subr.bf16.mxu0 %v326_v0  ;;  %215 = vmatprep.mubr.msk.f32.mxu0 %vm327_vm0, %v328_v1  ;;  %v49_v3 = vld [vmem:[#allocation5 + $0x8] sm:$0xff]  ;;  %v50_v4 = vld [vmem:[#allocation5 + $0x10] sm:$0xff]  ;;  %v51_v6 = vld [vmem:[#allocation5 + $0x18] sm:$0xff]  ;;  %s329_s11 = smov [#allocation7]  }
  0x28   :  { %v219_v5 = vpack.c.bf16 %v49_v3, %v48_v2  ;;  %v222_v7 = vpack.c.bf16 %v51_v6, %v50_v4  ;;  %v52_v8 = vld [vmem:[#allocation5 + $0x20] sm:$0xff]  ;;  %v53_v9 = vld [vmem:[#allocation5 + $0x28] sm:$0xff]  ;;  %v54_v11 = vld [vmem:[#allocation5 + $0x30] sm:$0xff]  ;;  %s155_s12 = sshll.u32 %s329_s11, 4  ;;  %s156_s12 = int_to_ptr.vmem [resolvable:$true] %s155_s12 }
  0x29   :  { %v225_v10 = vpack.c.bf16 %v53_v9, %v52_v8  ;;  %v55_v12 = vld [vmem:[#allocation5 + $0x38] sm:$0xff]  ;;  %v56_v14 = vld [vmem:[#allocation5 + $0x40] sm:$0xff]  ;;  %v57_v15 = vld [vmem:[#allocation5 + $0x48] sm:$0xff]  ;;  %s294_s13 = scalar_lea.vmem %s156_s12, 128  ;;  %p299_p3 = scmp.lt.s32.totalorder %s156_s12, %s156_s12 }
  0x2a   :  { %220 = vmatpush3.bf16.msra.mxu0 %v219_v5  ;;  %v228_v13 = vpack.c.bf16 %v55_v12, %v54_v11  ;;  %v231_v16 = vpack.c.bf16 %v57_v15, %v56_v14  ;;  %v58_v17 = vld [vmem:[#allocation5 + $0x50] sm:$0xff]  ;;  %v59_v18 = vld [vmem:[#allocation5 + $0x58] sm:$0xff]  ;;  %v60_v20 = vld [vmem:[#allocation5 + $0x60] sm:$0xff]  ;;  %p295_p2 = scmp.ne.s32.totalorder %s156_s12, %s294_s13  ;;  %p300_p4 = scmp.lt.s32.totalorder %s294_s13, %s294_s13 }
  0x2b   :  { %221 = vmatprep.subr.bf16.mxu0 %v326_v0  ;;  %v234_v19 = vpack.c.bf16 %v59_v18, %v58_v17  ;;  %v61_v21 = vld [vmem:[#allocation5 + $0x68] sm:$0xff]  ;;  %v62_v23 = vld [vmem:[#allocation5 + $0x70] sm:$0xff]  ;;  %v63_v24 = vld [vmem:[#allocation5 + $0x78] sm:$0xff] }
  0x2c   :  { %v237_v22 = vpack.c.bf16 %v61_v21, %v60_v20  ;;  %v240_v25 = vpack.c.bf16 %v63_v24, %v62_v23  ;;  %v47_v26 = vld [vmem:[#allocation2] sm:$0xff]  ;;  %p301_p5 = por %p300_p4, %p299_p3 }
  0x2d   :  { %v165_v28 = vld [vmem:[%s398_s2] ss:$0 sm:$0xff] }
  0x2e   :  { %223 = vmatpush3.bf16.msra.mxu0 %v222_v7  ;;  %p302_p6 = pnand %p301_p5, %p295_p2 }
  0x2f   :  { %224 = vmatprep.subr.bf16.mxu0 %v326_v0 }
  0x32   :  { %226 = vmatpush3.bf16.msra.mxu0 %v225_v10 }
  0x33   :  { %227 = vmatprep.subr.bf16.mxu0 %v326_v0 }
  0x36   :  { %229 = vmatpush3.bf16.msra.mxu0 %v228_v13 }
  0x37   :  { %230 = vmatprep.subr.bf16.mxu0 %v326_v0 }
  0x3a   :  { %232 = vmatpush3.bf16.msra.mxu0 %v231_v16 }
  0x3b   :  { %233 = vmatprep.subr.bf16.mxu0 %v326_v0 }
  0x3e   :  { %235 = vmatpush3.bf16.msra.mxu0 %v234_v19 }
  0x3f   :  { %236 = vmatprep.subr.bf16.mxu0 %v326_v0 }
  0x42   :  { %238 = vmatpush3.bf16.msra.mxu0 %v237_v22 }
  0x43   :  { %239 = vmatprep.subr.bf16.mxu0 %v326_v0 }
  0x46   :  { %241 = vmatpush3.bf16.msra.mxu0 %v240_v25 }
  0x49   :  { %216 = vmatmul.mubr.f32.vlgmr.msra.gmra.mrb[0].mxu0 %v47_v26 }
 0x11c   :  { %v130_v27 = vpop.f32.mrb[0].mxu0 }
 0x11d   :  { %v217_v29 = vpop.f32.mrb[1].mxu0  ;;  %v147_v30 = vmul.f32 %v165_v28, %v130_v27 }
 0x11f   :  { %148 = vst [vmem:[#allocation7] sm:$0xff] %v147_v30 }
 0x120   :  { %305 = shalt.err (!%p302_p6)
}
 0x121   :  { %s306_s16 = scalar_lea.hbm %s399_s3, 128 }
 0x122   :  { %p307_p7 = scmp.ne.s32.totalorder %s399_s3, %s306_s16  ;;  %p310_p8 = scmp.lt.u32.totalorder %s306_s16, %s399_s3 }
 0x124   :  { %p312_p9 = pnand %p310_p8, %p307_p7 }
 0x126   :  { %315 = shalt.err (!%p312_p9)
}
 0x127   :  { %158 = dma.vmem_to_hbm [thread:$0]  %s156_s12, 128, %s399_s3, [#allocation4]  }
 0x128   :  { %320 = dma.done.wait [#allocation4], 128  }
 0x129   :  { %321 = vsyncadd [#allocation4], 4294967168 }
 0x12a   :  { %162 = vsyncpa [#allocation3], 1 }
 0x12b   :  { %163 = vsyncpa [#allocation6], 1 }
 0x12c   :  { %164 = vsyncpa [#allocation4], 1 }

</bundles_post_ra>
